<compile_context>
chip_gen: v6e
topology: v6e:2x2x1
jax: 0.10.0
libtpu: 0.0.40
codegen_flags: <defaults>
</compile_context>

<pallas_src>
import functools

import jax
import jax.numpy as jnp
import numpy as np
from jax.experimental import pallas as pl
from jax.experimental.pallas import tpu as pltpu

# Model hyper-parameters (small, consistent with the module's __init__).
VOCAB_SIZE = 64
EMBEDDING_DIM = 16
CONTEXT_SIZE = 2          # trigram model: 2 context words predict the 3rd
HIDDEN_DIM = 32
BATCH = 8


def trigram_mlp_kernel(ids_ref, table_ref, b1_ref, w2t_ref, mask_ref, out_ref,
                       *, vocab_size, context_size):
    """Fused forward.

    ids_ref   : (B, C)     int32, VMEM (token ids)
    table_ref : (C*V, H)   f32,  VMEM (fused blockdiag(emb) @ w1^T table)
    b1_ref    : (1, H)     f32,  VMEM
    w2t_ref   : (H, Vpad)  f32,  VMEM (pre-transposed, vocab padded to 128n)
    mask_ref  : (1, Vpad)  f32,  VMEM (additive pad mask: 0 real, -1e30 pad)
    out_ref   : (B, Vpad)  f32,  VMEM (lane-dense log-probs)
    """
    B = ids_ref.shape[0]
    CV, _ = table_ref.shape

    # --- fused embedding gather as a one-hot matmul -------------------------
    # Build the (B, C*V) one-hot with vectorized iota/compare: no scalar
    # reads, no dynamic sub-tile loads, no masked stores.  Context slot c
    # occupies lanes [c*V, (c+1)*V).
    ids = ids_ref[...]                                          # (B, C) int32
    lane = jax.lax.broadcasted_iota(jnp.int32, (B, CV), 1)
    onehot = jnp.zeros((B, CV), jnp.float32)
    for c in range(context_size):                               # C=2, unrolled
        tok = ids[:, c:c + 1] + c * vocab_size                  # (B, 1)
        onehot = onehot + (lane == tok).astype(jnp.float32)

    # --- embedding + linear1 collapsed into ONE MXU op, then tanh ----------
    h = jnp.tanh(
        jnp.dot(onehot, table_ref[...], preferred_element_type=jnp.float32)
        + b1_ref[...]
    )

    # --- linear2 (no bias) + additive vocab-pad mask ------------------------
    logits = (jnp.dot(h, w2t_ref[...], preferred_element_type=jnp.float32)
              + mask_ref[...])

    # --- numerically stable log_softmax over the (lane) vocab axis ---------
    m = jnp.max(logits, axis=1, keepdims=True)
    z = logits - m
    lse = jnp.log(jnp.sum(jnp.exp(z), axis=1, keepdims=True))
    out_ref[...] = (z - lse).astype(out_ref.dtype)


def prepare_params(emb, w1, b1, w2, context_size=CONTEXT_SIZE):
    """One-time layout plumbing (outside the hot path).

    * Embedding table and linear1 weight fused into a single (C*V, H) table:
      table = concat_c( emb @ w1^T[c*E:(c+1)*E, :] ), so that
      linear1(concat_c emb[ids_c]) == onehot(B, C*V) @ table.
    * w2 pre-transposed, vocab (output) axis zero-padded to a multiple of 128.
    * Precomputed additive pad-mask row for the logits.
    """
    emb = jnp.asarray(emb, jnp.float32)
    w1 = jnp.asarray(w1, jnp.float32)
    b1 = jnp.asarray(b1, jnp.float32)
    w2 = jnp.asarray(w2, jnp.float32)

    V, E = emb.shape
    H = w1.shape[0]
    C = context_size
    VP = max(128, ((V + 127) // 128) * 128)

    w1t = w1.T                                                   # (C*E, H)
    table = jnp.concatenate(
        [emb @ w1t[c * E:(c + 1) * E, :] for c in range(C)], axis=0
    )                                                            # (C*V, H)

    w2t_pad = jnp.zeros((H, VP), jnp.float32).at[:, :V].set(w2.T)
    col = jnp.arange(VP)
    pad_mask = jnp.where(col < V, 0.0, -1e30).astype(jnp.float32).reshape(1, VP)

    return {
        "table": table,                                          # (C*V, H)
        "b1": b1.reshape(1, H),
        "w2t": w2t_pad,                                          # (H, VP)
        "mask": pad_mask,                                        # (1, VP)
        "vocab": V,
        "vocab_pad": VP,
        "context": C,
    }


def trigram_forward(inputs, params):
    """Forward pass matching TrigramNNmodel.forward -> (B, V) log-probs."""
    table, b1, w2t, mask = (params["table"], params["b1"],
                            params["w2t"], params["mask"])
    V, VP, C = params["vocab"], params["vocab_pad"], params["context"]

    B = inputs.shape[0]
    CV, H = table.shape
    ids = inputs.astype(jnp.int32)

    kernel = functools.partial(trigram_mlp_kernel,
                               vocab_size=V, context_size=C)

    flops = 2 * B * CV * H + 2 * B * H * VP
    transcendentals = B * H + B * VP                 # tanh + exp
    bytes_accessed = 4 * (ids.size + table.size + b1.size + w2t.size
                          + mask.size + B * VP)

    out_padded = pl.pallas_call(
        kernel,
        out_shape=jax.ShapeDtypeStruct((B, VP), jnp.float32),
        in_specs=[
            pl.BlockSpec(memory_space=pltpu.MemorySpace.VMEM),   # token ids
            pl.BlockSpec(memory_space=pltpu.MemorySpace.VMEM),   # fused table
            pl.BlockSpec(memory_space=pltpu.MemorySpace.VMEM),   # b1
            pl.BlockSpec(memory_space=pltpu.MemorySpace.VMEM),   # w2^T (padded)
            pl.BlockSpec(memory_space=pltpu.MemorySpace.VMEM),   # pad mask
        ],
        out_specs=pl.BlockSpec(memory_space=pltpu.MemorySpace.VMEM),
        cost_estimate=pl.CostEstimate(
            flops=flops,
            transcendentals=transcendentals,
            bytes_accessed=bytes_accessed,
        ),
    )(ids, table, b1, w2t, mask)

    # Drop the lane padding; semantics match the PyTorch module: (B, V).
    return out_padded[:, :V]


def reference_forward(inputs, emb, w1, b1, w2):
    """Pure-JAX reference of the PyTorch module for verification."""
    x = jnp.take(emb, inputs, axis=0).reshape(inputs.shape[0], -1)
    h = jnp.tanh(x @ w1.T + b1)
    logits = h @ w2.T
    return jax.nn.log_softmax(logits, axis=1)


if __name__ == "__main__":
    key = jax.random.PRNGKey(0)
    k_in, k_emb, k_w1, k_b1, k_w2 = jax.random.split(key, 5)

    # Deterministic synthetic parameters (shapes from the module __init__).
    inputs = jax.random.randint(
        k_in, (BATCH, CONTEXT_SIZE), 0, VOCAB_SIZE, dtype=jnp.int32
    )
    emb = jax.random.normal(k_emb, (VOCAB_SIZE, EMBEDDING_DIM), jnp.float32)
    w1 = jax.random.normal(
        k_w1, (HIDDEN_DIM, CONTEXT_SIZE * EMBEDDING_DIM), jnp.float32
    ) * 0.1
    b1 = jax.random.normal(k_b1, (1, HIDDEN_DIM), jnp.float32) * 0.1
    w2 = jax.random.normal(k_w2, (VOCAB_SIZE, HIDDEN_DIM), jnp.float32) * 0.1

    params = prepare_params(emb, w1, b1, w2)

    log_probs = trigram_forward(inputs, params)
    jax.block_until_ready(log_probs)

    ref = reference_forward(inputs, emb, w1, b1, w2)
    np.testing.assert_allclose(
        np.asarray(log_probs), np.asarray(ref), atol=1e-5, rtol=1e-5
    )
    # log_softmax rows must sum (in prob space) to 1
    np.testing.assert_allclose(
        np.exp(np.asarray(log_probs)).sum(axis=1), np.ones(BATCH), atol=1e-5
    )

    print("KERNEL_OK")
</pallas_src>

<mosaic_0001>
module attributes {stable_mosaic.version = 11 : i64} {
  func.func @trigram_mlp_kernel(%arg0: memref<8x2xi32, #tpu.memory_space<vmem>>, %arg1: memref<128x32xf32, #tpu.memory_space<vmem>>, %arg2: memref<1x32xf32, #tpu.memory_space<vmem>>, %arg3: memref<32x128xf32, #tpu.memory_space<vmem>>, %arg4: memref<1x128xf32, #tpu.memory_space<vmem>>, %arg5: memref<8x128xf32, #tpu.memory_space<vmem>>) attributes {dimension_semantics = [], scalar_prefetch = 0 : i64, scratch_operands = 0 : i64, tpu.core_type = #tpu.core_type<tc>} {
    %c0 = arith.constant 0 : index
    %c0_0 = arith.constant 0 : index
    %0 = vector.load %arg0[%c0, %c0_0] : memref<8x2xi32, #tpu.memory_space<vmem>>, vector<8x2xi32>
    %1 = tpu.iota {dimensions = array<i32: 1>} : vector<8x128xi32>
    %cst = arith.constant 0.000000e+00 : f32
    %2 = vector.broadcast %cst : f32 to vector<8x128xf32>
    %3 = vector.extract_strided_slice %0 {offsets = [0, 0], sizes = [8, 1], strides = [1, 1]} : vector<8x2xi32> to vector<8x1xi32>
    %c0_i32 = arith.constant 0 : i32
    %4 = vector.broadcast %c0_i32 : i32 to vector<8x1xi32>
    %5 = arith.addi %3, %4 : vector<8x1xi32>
    %6 = vector.broadcast %5 : vector<8x1xi32> to vector<8x128xi32>
    %7 = arith.cmpi eq, %1, %6 : vector<8x128xi32>
    %8 = arith.extui %7 : vector<8x128xi1> to vector<8x128xi32>
    %9 = arith.sitofp %8 : vector<8x128xi32> to vector<8x128xf32>
    %10 = arith.addf %2, %9 : vector<8x128xf32>
    %11 = vector.extract_strided_slice %0 {offsets = [0, 1], sizes = [8, 1], strides = [1, 1]} : vector<8x2xi32> to vector<8x1xi32>
    %c64_i32 = arith.constant 64 : i32
    %12 = vector.broadcast %c64_i32 : i32 to vector<8x1xi32>
    %13 = arith.addi %11, %12 : vector<8x1xi32>
    %14 = vector.broadcast %13 : vector<8x1xi32> to vector<8x128xi32>
    %15 = arith.cmpi eq, %1, %14 : vector<8x128xi32>
    %16 = arith.extui %15 : vector<8x128xi1> to vector<8x128xi32>
    %17 = arith.sitofp %16 : vector<8x128xi32> to vector<8x128xf32>
    %18 = arith.addf %10, %17 : vector<8x128xf32>
    %c0_1 = arith.constant 0 : index
    %c0_2 = arith.constant 0 : index
    %19 = vector.load %arg1[%c0_1, %c0_2] : memref<128x32xf32, #tpu.memory_space<vmem>>, vector<128x32xf32>
    %cst_3 = arith.constant dense<0.000000e+00> : vector<8x32xf32>
    %20 = tpu.matmul %18, %19, %cst_3 {dimension_numbers = #tpu.dot_dimension_numbers<[1], [0], [0], [1], [0, 0, 1, 1], [], []>} : vector<8x128xf32>, vector<128x32xf32>, vector<8x32xf32> -> vector<8x32xf32>
    %c0_4 = arith.constant 0 : index
    %c0_5 = arith.constant 0 : index
    %21 = vector.load %arg2[%c0_4, %c0_5] : memref<1x32xf32, #tpu.memory_space<vmem>>, vector<1x32xf32>
    %22 = vector.broadcast %21 : vector<1x32xf32> to vector<8x32xf32>
    %23 = arith.addf %20, %22 : vector<8x32xf32>
    %24 = math.tanh %23 : vector<8x32xf32>
    %c0_6 = arith.constant 0 : index
    %c0_7 = arith.constant 0 : index
    %25 = vector.load %arg3[%c0_6, %c0_7] : memref<32x128xf32, #tpu.memory_space<vmem>>, vector<32x128xf32>
    %cst_8 = arith.constant dense<0.000000e+00> : vector<8x128xf32>
    %26 = tpu.matmul %24, %25, %cst_8 {dimension_numbers = #tpu.dot_dimension_numbers<[1], [0], [0], [1], [0, 0, 1, 1], [], []>} : vector<8x32xf32>, vector<32x128xf32>, vector<8x128xf32> -> vector<8x128xf32>
    %c0_9 = arith.constant 0 : index
    %c0_10 = arith.constant 0 : index
    %27 = vector.load %arg4[%c0_9, %c0_10] : memref<1x128xf32, #tpu.memory_space<vmem>>, vector<1x128xf32>
    %28 = vector.broadcast %27 : vector<1x128xf32> to vector<8x128xf32>
    %29 = arith.addf %26, %28 : vector<8x128xf32>
    %cst_11 = arith.constant dense<0xFF800000> : vector<8xf32>
    %30 = vector.multi_reduction <maximumf>, %29, %cst_11 [1] : vector<8x128xf32> to vector<8xf32>
    %31 = vector.shape_cast %30 : vector<8xf32> to vector<8x1xf32>
    %32 = vector.broadcast %31 : vector<8x1xf32> to vector<8x128xf32>
    %33 = arith.subf %29, %32 : vector<8x128xf32>
    %34 = math.exp %33 : vector<8x128xf32>
    %cst_12 = arith.constant dense<0.000000e+00> : vector<8xf32>
    %35 = vector.multi_reduction <add>, %34, %cst_12 [1] : vector<8x128xf32> to vector<8xf32>
    %36 = vector.shape_cast %35 : vector<8xf32> to vector<8x1xf32>
    %37 = math.log %36 : vector<8x1xf32>
    %38 = vector.broadcast %37 : vector<8x1xf32> to vector<8x128xf32>
    %39 = arith.subf %33, %38 : vector<8x128xf32>
    %c0_13 = arith.constant 0 : index
    %c0_14 = arith.constant 0 : index
    %40 = vector.load %arg5[%c0_13, %c0_14] : memref<8x128xf32, #tpu.memory_space<vmem>>, vector<8x128xf32>
    tpu.vector_store %arg5[%c0_13, %c0_14], %39 {strides = array<i32>} : memref<8x128xf32, #tpu.memory_space<vmem>>, vector<8x128xf32>,
    return
  }
}

</mosaic_0001>

<bundles_post_ra>
// kernel: tpu_custom_call.1
= control target key start
LH: loop header
LB: loop body
LE: loop exit
PB: predicated region body
PF: predicated region fallthrough
CT: control target
= control target key end

     0   :  { %v351_v2 = vmov 0   ;;  %v352_v3 = vmov 0.0   ;;  %s482_s0 = inlined_call_operand.vmem [shape: s32[8,2], index: 0, kind: input, shape index: {}]   ;;  %s483_s1 = inlined_call_operand.vmem [shape: f32[128,32], index: 1, kind: input, shape index: {}]   ;;  %s484_s2 = inlined_call_operand.vmem [shape: f32[1,32], index: 2, kind: input, shape index: {}]   ;;  %s485_s3 = inlined_call_operand.vmem [shape: f32[32,128], index: 3, kind: input, shape index: {}]   ;;  %s486_s4 = inlined_call_operand.vmem [shape: f32[1,128], index: 4, kind: input, shape index: {}]   ;;  %s487_s5 = inlined_call_operand.hbm [shape: f32[8,128], index: 5, kind: output, shape index: {}]  }
   0x1   :  { %v21_v0 = vld [vmem:[%s482_s0] sm:$0xff]  ;;  %v54_v1 = vld [vmem:[%s483_s1 + $0x78] sm:$0xff]  ;;  %321 = vset.pattern.permute.xlu0 %v351_v2  ;;  %270 = vmatprep.subr.mxu0 %v352_v3  ;;  %v53_v4 = vld [vmem:[%s483_s1 + $0x70] sm:$0xff] }
   0x2   :  { %25 = vperm.xlu0 %321, %v21_v0   ;;  %271 = vmatpush3.msra.mxu0 %v54_v1  ;;  %v31_v5 = vadd.s32 64, %v21_v0  ;;  %v52_v6 = vld [vmem:[%s483_s1 + $0x68] sm:$0xff]  ;;  %v51_v7 = vld [vmem:[%s483_s1 + $0x60] sm:$0xff] }
   0x3   :  { %272 = vmatprep.subr.mxu0 %v352_v3  ;;  %305 = vmatprep.subr.mxu1 %v352_v3 }
   0x4   :  { %273 = vmatpush3.msra.mxu0 %v53_v4 }
   0x5   :  { %274 = vmatprep.subr.mxu0 %v352_v3 }
   0x6   :  { %10 = vsyncpa [#allocation3], 0  ;;  %v353_v8 = vmov 1   ;;  %275 = vmatpush3.msra.mxu0 %v52_v6  ;;  %v50_v9 = vld [vmem:[%s483_s1 + $0x58] sm:$0xff]  ;;  %vm354_vm0 = vmmov 0   ;;  %v49_v10 = vld [vmem:[%s483_s1 + $0x50] sm:$0xff]  ;;  %v22_v21 = vlaneseq }
   0x7   :  { %322 = vset.pattern.permute.xlu0 %v353_v8  ;;  %276 = vmatprep.subr.mxu0 %v352_v3  ;;  %v48_v11 = vld [vmem:[%s483_s1 + $0x48] sm:$0xff]  ;;  %v47_v12 = vld [vmem:[%s483_s1 + $0x40] sm:$0xff]  ;;  %v46_v13 = vld [vmem:[%s483_s1 + $0x38] sm:$0xff]  ;;  %vm144_vm3 = vcmask 261120  }
   0x8   :  { %33 = vperm.xlu0 %322, %v31_v5   ;;  %277 = vmatpush3.msra.mxu0 %v51_v7  ;;  %v45_v14 = vld [vmem:[%s483_s1 + $0x30] sm:$0xff]  ;;  %v44_v15 = vld [vmem:[%s483_s1 + $0x28] sm:$0xff]  ;;  %v43_v16 = vld [vmem:[%s483_s1 + $0x20] sm:$0xff]  ;;  %v23_v22 = vand.u32 127, %v22_v21 }
   0x9   :  { %302 = vmatprep.mubr.msk.f32.mxu0 %vm354_vm0, %v352_v3  ;;  %278 = vmatprep.subr.mxu0 %v352_v3  ;;  %v42_v17 = vld [vmem:[%s483_s1 + $0x18] sm:$0xff]  ;;  %v41_v18 = vld [vmem:[%s483_s1 + $0x10] sm:$0xff]  ;;  %v40_v19 = vld [vmem:[%s483_s1 + $0x8] sm:$0xff] }
   0xa   :  { %313 = vmatprep.mubr.msk.f32.mxu1 %vm354_vm0, %v352_v3  ;;  %279 = vmatpush3.msra.mxu0 %v50_v9  ;;  %v39_v20 = vld [vmem:[%s483_s1] sm:$0xff]  ;;  %v136_v28 = vld [vmem:[%s485_s3 + $0x18] sm:$0xff]  ;;  %v135_v29 = vld [vmem:[%s485_s3 + $0x10] sm:$0xff] }
   0xb   :  { %280 = vmatprep.subr.mxu0 %v352_v3  ;;  %306 = vmatpush3.msra.mxu1 %v136_v28  ;;  %v134_v30 = vld [vmem:[%s485_s3 + $0x8] sm:$0xff]  ;;  %v133_v31 = vld [vmem:[%s485_s3] sm:$0xff] }
   0xc   :  { %281 = vmatpush3.msra.mxu0 %v49_v10  ;;  %307 = vmatprep.subr.mxu1 %v352_v3  ;;  %v245_v32 = vld [vmem:[%s484_s2] ss:$0 sm:$0xff]  ;;  %s355_s2 = smov [#allocation2]  }
   0xd   :  { %282 = vmatprep.subr.mxu0 %v352_v3  ;;  %308 = vmatpush3.msra.mxu1 %v135_v29  ;;  %v246_v37 = vld [vmem:[%s486_s4] ss:$0 sm:$0xff]  ;;  %s235_s3 = sshll.u32 %s355_s2, 4  ;;  %s236_s3 = int_to_ptr.vmem [resolvable:$true] %s235_s3 }
   0xe   :  { %283 = vmatpush3.msra.mxu0 %v48_v11  ;;  %309 = vmatprep.subr.mxu1 %v352_v3  ;;  %s329_s4 = scalar_lea.vmem %s236_s3, 128  ;;  %p334_p1 = scmp.lt.s32.totalorder %s236_s3, %s236_s3 }
   0xf   :  { %284 = vmatprep.subr.mxu0 %v352_v3  ;;  %310 = vmatpush3.msra.mxu1 %v134_v30  ;;  %p330_p0 = scmp.ne.s32.totalorder %s236_s3, %s329_s4  ;;  %p335_p2 = scmp.lt.s32.totalorder %s329_s4, %s329_s4 }
  0x10   :  { %285 = vmatpush3.msra.mxu0 %v47_v12  ;;  %311 = vmatprep.subr.mxu1 %v352_v3 }
  0x11   :  { %286 = vmatprep.subr.mxu0 %v352_v3  ;;  %312 = vmatpush3.msra.mxu1 %v133_v31  ;;  %p336_p3 = por %p335_p2, %p334_p1 }
  0x12   :  { %287 = vmatpush3.msra.mxu0 %v46_v13 }
  0x13   :  { %288 = vmatprep.subr.mxu0 %v352_v3  ;;  %p337_p4 = pnand %p336_p3, %p330_p0 }
  0x14   :  { %289 = vmatpush3.msra.mxu0 %v45_v14 }
  0x15   :  { %290 = vmatprep.subr.mxu0 %v352_v3 }
  0x16   :  { %291 = vmatpush3.msra.mxu0 %v44_v15 }
  0x17   :  { %292 = vmatprep.subr.mxu0 %v352_v3 }
  0x18   :  { %293 = vmatpush3.msra.mxu0 %v43_v16 }
  0x19   :  { %294 = vmatprep.subr.mxu0 %v352_v3 }
  0x1a   :  { %295 = vmatpush3.msra.mxu0 %v42_v17 }
  0x1b   :  { %296 = vmatprep.subr.mxu0 %v352_v3 }
  0x1c   :  { %297 = vmatpush3.msra.mxu0 %v41_v18 }
  0x1d   :  { %298 = vmatprep.subr.mxu0 %v352_v3 }
  0x1e   :  { %299 = vmatpush3.msra.mxu0 %v40_v19 }
  0x1f   :  { %300 = vmatprep.subr.mxu0 %v352_v3 }
  0x20   :  { %301 = vmatpush3.msra.mxu0 %v39_v20 }
  0x7d   :  { %v26_v23 = vpop.permute.xlu0 %25 }
  0x7e   :  { %vm27_vm1 = vcmp.eq.s32.totalorder %v23_v22, %v26_v23 }
  0x7f   :  { %v243_v25 = vsel %vm27_vm1, 1.0, %v352_v3 }
  0x83   :  { %v34_v24 = vpop.permute.xlu0 %33 }
  0x84   :  { %vm35_vm2 = vcmp.eq.s32.totalorder %v23_v22, %v34_v24 }
  0x85   :  { %v244_v26 = vsel %vm35_vm2, 1.0, %v352_v3 }
  0x86   :  { %v38_v27 = vadd.f32 %v244_v26, %v243_v25 }
  0x88   :  { %303 = vmatmul.mubr.f32.vlgmr.msra.gmra.mxu0 %v38_v27 }
 0x148   :  { %v128_v33 = vpop.f32.mrf.mxu0 }
 0x149   :  { %v129_v34 = vadd.f32 %v245_v32, %v128_v33 }
 0x14a   :  { %v304_v35 = vpop.f32.mrf.mxu0 }
 0x14b   :  { %323 = vtanh.f32 %v129_v34 }
 0x158   :  { %v324_v36 = vpop.eup %323 }
 0x159   :  { %314 = vmatmul.mubr.msk.f32.vlgmr.msra.gmra.mxu1 %vm144_vm3, %v324_v36 }
 0x219   :  { %v214_v38 = vpop.f32.mrf.mxu1 }
 0x21a   :  { %v215_v39 = vadd.f32 %v246_v37, %v214_v38 }
 0x21b   :  { %v315_v40 = vpop.f32.mrf.mxu1 }
 0x21c   :  { %218 = vmax.xlane.f32.xlu1 %v215_v39 }
 0x2a5   :  { %v219_v41 = vpop.xlane.xlu1 %218 }
 0x2a6   :  { %v220_v42 = vsub.f32 %v215_v39, %v219_v41 }
 0x2a8   :  { %v221_v43 = vmul.f32 1.442695, %v220_v42 }
 0x2aa   :  { %325 = vpow2.f32 %v221_v43 }
 0x2b7   :  { %v326_v44 = vpop.eup %325 }
 0x2b8   :  { %223 = vadd.xlane.f32.xlu1 %v326_v44 }
 0x341   :  { %v224_v45 = vpop.xlane.xlu1 %223 }
 0x342   :  { %327 = vlog2.f32 %v224_v45 }
 0x34f   :  { %v328_v46 = vpop.eup %327 }
 0x350   :  { %v226_v47 = vmul.f32 0.6931472, %v328_v46 }
 0x352   :  { %v227_v48 = vsub.f32 %v220_v42, %v226_v47 }
 0x354   :  { %228 = vst [vmem:[#allocation2] sm:$0xff] %v227_v48 }
 0x355   :  { %340 = shalt.err (!%p337_p4)
}
 0x356   :  { %238 = dma.vmem_to_hbm [thread:$0]  %s236_s3, 128, %s487_s5, [#allocation3]  }
 0x357   :  { %349 = dma.done.wait [#allocation3], 128  }
 0x358   :  { %350 = vsyncadd [#allocation3], 4294967168 }
 0x359   :  { %242 = vsyncpa [#allocation3], 1 }

</bundles_post_ra>
